<compile_context>
chip_gen: v6e
topology: v6e:2x2x1
jax: 0.10.0
libtpu: 0.0.40
codegen_flags: <defaults>
</compile_context>

<pallas_src>
import functools
import math

import jax
import jax.numpy as jnp
from jax.experimental import pallas as pl
from jax.experimental.pallas import tpu as pltpu


def _gated_mlp_kernel(x_ref, wgu_ref, wd_ref, o_ref, acc_ref, *, ti):
    """One (row-tile, I-tile) step of the gated MLP.

    x_ref   : (tm, D)        token tile (input dtype)
    wgu_ref : (1, D, 2*ti)   packed [gate | up] weight tile
    wd_ref  : (ti, D)        down-projection weight tile
    o_ref   : (tm, D)        output tile (written on last I step)
    acc_ref : (tm, D) f32    VMEM accumulator (persistent across I steps)
    """
    j = pl.program_id(1)

    @pl.when(j == 0)
    def _init():
        acc_ref[...] = jnp.zeros_like(acc_ref)

    x = x_ref[...]                 # (tm, D)
    wgu = wgu_ref[0]               # (D, 2*ti), fused gate|up tile

    # Fused gate+up projection: one MXU pass, f32 accumulation.
    gu = jnp.dot(x, wgu, preferred_element_type=jnp.float32)   # (tm, 2*ti) f32
    gate = gu[:, :ti]
    up = gu[:, ti:]

    # SiLU and gating in f32 on the VPU/EUP (fast path on all generations).
    h = (gate * jax.nn.sigmoid(gate)) * up                     # (tm, ti) f32

    # Down projection of this I-tile: cast h to the weight dtype (bf16 fast
    # path for the MXU), accumulate the partial product in f32.
    acc_ref[...] += jnp.dot(
        h.astype(wd_ref.dtype), wd_ref[...], preferred_element_type=jnp.float32
    )

    @pl.when(j == pl.num_programs(1) - 1)
    def _finalize():
        o_ref[...] = acc_ref[...].astype(o_ref.dtype)


def _pick_inter_tile(inter_dim, requested):
    """Largest multiple of 128 that divides I and is <= 512 (else I itself)."""
    if requested is not None:
        assert inter_dim % requested == 0, "ti must divide inter_dim"
        return requested
    if inter_dim % 128 != 0:
        return inter_dim            # small / unaligned I: keep it whole
    t = min(512, inter_dim)
    while inter_dim % t != 0:
        t -= 128
    return t


def gated_mlp(x, w_gate, w_up, w_down, *, tm=None, ti=None):
    """Gated (SwiGLU-style) MLP forward.  x: (B, S, D) -> (B, S, D)."""
    B, S, D = x.shape
    I = w_gate.shape[1]
    assert w_gate.shape == (D, I) and w_up.shape == (D, I) and w_down.shape == (I, D)

    M = B * S
    x2 = x.reshape(M, D)

    # --- row tile: multiple of 8 sublanes; ~256 rows keeps the MXU fed while
    #     leaving VMEM room for the double-buffered weight tiles ---
    if tm is None:
        tm = 256 if M >= 256 else ((M + 7) // 8) * 8
    else:
        assert tm % 8 == 0, "tm must be a multiple of 8"
    M_pad = ((M + tm - 1) // tm) * tm
    if M_pad != M:                         # ragged token count: zero-pad rows
        x2 = jnp.pad(x2, ((0, M_pad - M), (0, 0)))

    # --- intermediate-dimension tile ---
    ti = _pick_inter_tile(I, ti)
    nI = I // ti

    # Pack gate/up weight tiles side by side: (nI, D, 2*ti).
    # (In production, pre-pack once at weight-load time instead of per call.)
    wg_t = w_gate.reshape(D, nI, ti).transpose(1, 0, 2)
    wu_t = w_up.reshape(D, nI, ti).transpose(1, 0, 2)
    w_gu = jnp.concatenate([wg_t, wu_t], axis=2)       # (nI, D, 2*ti)

    grid = (M_pad // tm, nI)

    # VMEM budget: double-buffered pipeline tiles + the f32 accumulator.
    bp = jnp.dtype(x.dtype).itemsize
    budget = (2 * tm * D * bp            # x tiles
              + 2 * D * 2 * ti * bp      # packed gate/up weight tiles
              + 2 * ti * D * bp          # down-proj weight tiles
              + 2 * tm * D * bp          # output tiles
              + tm * D * 4)              # accumulator
    vmem_limit = int(min(max(1.5 * budget + (4 << 20), 16 << 20), 48 << 20))

    cost = pl.CostEstimate(
        flops=6 * M_pad * D * I,
        transcendentals=M_pad * I,
        bytes_accessed=bp * (2 * M_pad * D + 3 * D * I),
    )

    out2 = pl.pallas_call(
        functools.partial(_gated_mlp_kernel, ti=ti),
        out_shape=jax.ShapeDtypeStruct((M_pad, D), x.dtype),
        grid_spec=pltpu.PrefetchScalarGridSpec(
            num_scalar_prefetch=0,
            grid=grid,
            in_specs=[
                pl.BlockSpec((tm, D), lambda i, j: (i, 0)),            # x rows
                pl.BlockSpec((1, D, 2 * ti), lambda i, j: (j, 0, 0)),  # gate|up
                pl.BlockSpec((ti, D), lambda i, j: (j, 0)),            # down
            ],
            out_specs=pl.BlockSpec((tm, D), lambda i, j: (i, 0)),
            scratch_shapes=[pltpu.VMEM((tm, D), jnp.float32)],
        ),
        compiler_params=pltpu.CompilerParams(
            dimension_semantics=("parallel", "arbitrary"),
            vmem_limit_bytes=vmem_limit,
        ),
        cost_estimate=cost,
    )(x2, w_gu, w_down)

    return out2[:M].reshape(B, S, D)


def _reference(x, w_gate, w_up, w_down):
    """Pure-JAX reference matching the kernel's numerics (f32 accumulation)."""
    hp = jax.lax.Precision.HIGHEST
    gate = jnp.einsum("bsd,di->bsi", x, w_gate,
                      precision=hp, preferred_element_type=jnp.float32)
    up = jnp.einsum("bsd,di->bsi", x, w_up,
                    precision=hp, preferred_element_type=jnp.float32)
    h = (gate * jax.nn.sigmoid(gate)) * up
    out = jnp.einsum("bsi,id->bsd", h.astype(w_down.dtype), w_down,
                     precision=hp, preferred_element_type=jnp.float32)
    return out.astype(x.dtype)


if __name__ == "__main__":
    key = jax.random.PRNGKey(0)

    def init_linear(k, fan_in, fan_out, dtype):
        bound = 1.0 / math.sqrt(fan_in)
        w = jax.random.uniform(k, (fan_in, fan_out), minval=-bound,
                               maxval=bound, dtype=jnp.float32)
        return w.astype(dtype)

    def make_case(k, B, S, D, I, dtype):
        kx, kg, ku, kd = jax.random.split(k, 4)
        x = jax.random.normal(kx, (B, S, D), dtype=jnp.float32).astype(dtype)
        return (x,
                init_linear(kg, D, I, dtype),
                init_linear(ku, D, I, dtype),
                init_linear(kd, I, D, dtype))

    k1, k2, k3 = jax.random.split(key, 3)

    # Case 1: f32, lane-dense shapes, exercises both grid axes (2 row tiles x 4 I tiles).
    x, wg, wu, wd = make_case(k1, 2, 64, 256, 512, jnp.float32)
    out = jax.block_until_ready(gated_mlp(x, wg, wu, wd, tm=64, ti=128))
    ref = _reference(x, wg, wu, wd)
    assert out.shape == x.shape
    assert jnp.allclose(out, ref, atol=2e-3, rtol=2e-3), "f32 mismatch"

    # Case 2: bf16 fast path with automatic tile selection.
    xb, wgb, wub, wdb = make_case(k2, 2, 64, 256, 512, jnp.bfloat16)
    outb = jax.block_until_ready(gated_mlp(xb, wgb, wub, wdb))
    refb = _reference(xb, wgb, wub, wdb)
    assert jnp.allclose(outb.astype(jnp.float32), refb.astype(jnp.float32),
                        atol=3e-2, rtol=3e-2), "bf16 mismatch"

    # Case 3: ragged token count (row-padding path) + non-power-of-two I.
    xr, wgr, wur, wdr = make_case(k3, 2, 7, 256, 384, jnp.float32)
    outr = jax.block_until_ready(gated_mlp(xr, wgr, wur, wdr))
    refr = _reference(xr, wgr, wur, wdr)
    assert outr.shape == xr.shape
    assert jnp.allclose(outr, refr, atol=2e-3, rtol=2e-3), "ragged mismatch"

    print("KERNEL_OK")
</pallas_src>

<mosaic_0001>
module attributes {stable_mosaic.version = 11 : i64} {
  func.func @_gated_mlp_kernel(%arg0: i32, %arg1: i32, %arg2: memref<64x256xf32, #tpu.memory_space<vmem>>, %arg3: memref<1x256x256xf32, #tpu.memory_space<vmem>>, %arg4: memref<128x256xf32, #tpu.memory_space<vmem>>, %arg5: memref<64x256xf32, #tpu.memory_space<vmem>>, %arg6: memref<64x256xf32, #tpu.memory_space<vmem>>) attributes {dimension_semantics = [#tpu.dimension_semantics<parallel>, #tpu.dimension_semantics<arbitrary>], iteration_bounds = array<i64: 2, 4>, scalar_prefetch = 0 : i64, scratch_operands = 1 : i64, tpu.core_type = #tpu.core_type<tc>, window_params = [{transform_indices = @transform_0, window_bounds = array<i64: 64, 256>}, {transform_indices = @transform_1, window_bounds = array<i64: 1, 256, 256>}, {transform_indices = @transform_2, window_bounds = array<i64: 128, 256>}, {transform_indices = @transform_3, window_bounds = array<i64: 64, 256>}]} {
    %c0_i32 = arith.constant 0 : i32
    %0 = arith.cmpi eq, %arg1, %c0_i32 : i32
    %1 = arith.extui %0 : i1 to i32
    %c0_i32_0 = arith.constant 0 : i32
    %2 = arith.cmpi ne, %1, %c0_i32_0 : i32
    scf.if %2 {
      %cst_14 = arith.constant 0.000000e+00 : f32
      %24 = vector.broadcast %cst_14 : f32 to vector<64x256xf32>
      %c0_15 = arith.constant 0 : index
      %c0_16 = arith.constant 0 : index
      %25 = vector.load %arg6[%c0_15, %c0_16] : memref<64x256xf32, #tpu.memory_space<vmem>>, vector<64x256xf32>
      tpu.vector_store %arg6[%c0_15, %c0_16], %24 {strides = array<i32>} : memref<64x256xf32, #tpu.memory_space<vmem>>, vector<64x256xf32>,
    } else {
    }
    %c0 = arith.constant 0 : index
    %c0_1 = arith.constant 0 : index
    %3 = vector.load %arg2[%c0, %c0_1] : memref<64x256xf32, #tpu.memory_space<vmem>>, vector<64x256xf32>
    %c0_2 = arith.constant 0 : index
    %c0_3 = arith.constant 0 : index
    %c0_4 = arith.constant 0 : index
    %4 = vector.load %arg3[%c0_2, %c0_3, %c0_4] : memref<1x256x256xf32, #tpu.memory_space<vmem>>, vector<1x256x256xf32>
    %5 = vector.shape_cast %4 : vector<1x256x256xf32> to vector<256x256xf32>
    %cst = arith.constant dense<0.000000e+00> : vector<64x256xf32>
    %6 = tpu.matmul %3, %5, %cst {dimension_numbers = #tpu.dot_dimension_numbers<[1], [0], [0], [1], [0, 0, 1, 1], [], []>} : vector<64x256xf32>, vector<256x256xf32>, vector<64x256xf32> -> vector<64x256xf32>
    %7 = vector.extract_strided_slice %6 {offsets = [0, 0], sizes = [64, 128], strides = [1, 1]} : vector<64x256xf32> to vector<64x128xf32>
    %8 = vector.extract_strided_slice %6 {offsets = [0, 128], sizes = [64, 128], strides = [1, 1]} : vector<64x256xf32> to vector<64x128xf32>
    %9 = arith.negf %7 : vector<64x128xf32>
    %10 = math.exp %9 : vector<64x128xf32>
    %cst_5 = arith.constant 1.000000e+00 : f32
    %11 = vector.broadcast %cst_5 : f32 to vector<64x128xf32>
    %12 = arith.addf %11, %10 : vector<64x128xf32>
    %13 = arith.divf %11, %12 : vector<64x128xf32>
    %14 = arith.mulf %7, %13 : vector<64x128xf32>
    %15 = arith.mulf %14, %8 : vector<64x128xf32>
    %c0_6 = arith.constant 0 : index
    %c0_7 = arith.constant 0 : index
    %16 = vector.load %arg6[%c0_6, %c0_7] : memref<64x256xf32, #tpu.memory_space<vmem>>, vector<64x256xf32>
    %c0_8 = arith.constant 0 : index
    %c0_9 = arith.constant 0 : index
    %17 = vector.load %arg4[%c0_8, %c0_9] : memref<128x256xf32, #tpu.memory_space<vmem>>, vector<128x256xf32>
    %cst_10 = arith.constant dense<0.000000e+00> : vector<64x256xf32>
    %18 = tpu.matmul %15, %17, %cst_10 {dimension_numbers = #tpu.dot_dimension_numbers<[1], [0], [0], [1], [0, 0, 1, 1], [], []>} : vector<64x128xf32>, vector<128x256xf32>, vector<64x256xf32> -> vector<64x256xf32>
    %19 = arith.addf %16, %18 : vector<64x256xf32>
    %c0_11 = arith.constant 0 : index
    %c0_12 = arith.constant 0 : index
    %20 = vector.load %arg6[%c0_11, %c0_12] : memref<64x256xf32, #tpu.memory_space<vmem>>, vector<64x256xf32>
    tpu.vector_store %arg6[%c0_11, %c0_12], %19 {strides = array<i32>} : memref<64x256xf32, #tpu.memory_space<vmem>>, vector<64x256xf32>,
    %c3_i32 = arith.constant 3 : i32
    %21 = arith.cmpi eq, %arg1, %c3_i32 : i32
    %22 = arith.extui %21 : i1 to i32
    %c0_i32_13 = arith.constant 0 : i32
    %23 = arith.cmpi ne, %22, %c0_i32_13 : i32
    scf.if %23 {
      %c0_14 = arith.constant 0 : index
      %c0_15 = arith.constant 0 : index
      %24 = vector.load %arg6[%c0_14, %c0_15] : memref<64x256xf32, #tpu.memory_space<vmem>>, vector<64x256xf32>
      %c0_16 = arith.constant 0 : index
      %c0_17 = arith.constant 0 : index
      %25 = vector.load %arg5[%c0_16, %c0_17] : memref<64x256xf32, #tpu.memory_space<vmem>>, vector<64x256xf32>
      tpu.vector_store %arg5[%c0_16, %c0_17], %24 {strides = array<i32>} : memref<64x256xf32, #tpu.memory_space<vmem>>, vector<64x256xf32>,
    } else {
    }
    return
  }
  func.func @transform_0(%arg0: i32, %arg1: i32) -> (i32, i32) {
    %c0_i32 = arith.constant 0 : i32
    %c0_i32_0 = arith.constant 0 : i32
    return %arg0, %c0_i32 : i32, i32
  }
  func.func @transform_1(%arg0: i32, %arg1: i32) -> (i32, i32, i32) {
    %c0_i32 = arith.constant 0 : i32
    %c0_i32_0 = arith.constant 0 : i32
    %c0_i32_1 = arith.constant 0 : i32
    return %arg1, %c0_i32, %c0_i32_0 : i32, i32, i32
  }
  func.func @transform_2(%arg0: i32, %arg1: i32) -> (i32, i32) {
    %c0_i32 = arith.constant 0 : i32
    %c0_i32_0 = arith.constant 0 : i32
    return %arg1, %c0_i32 : i32, i32
  }
  func.func @transform_3(%arg0: i32, %arg1: i32) -> (i32, i32) {
    %c0_i32 = arith.constant 0 : i32
    %c0_i32_0 = arith.constant 0 : i32
    return %arg0, %c0_i32 : i32, i32
  }
}

</mosaic_0001>

<bundles_post_ra>
// kernel: tpu_custom_call.1
= control target key start
LH: loop header
LB: loop body
LE: loop exit
PB: predicated region body
PF: predicated region fallthrough
CT: control target
= control target key end

     0   :  { %s1794_s0 = inlined_call_operand.hbm [shape: f32[128,256], index: 0, kind: input, shape index: {}]   ;;  %s1795_s1 = inlined_call_operand.hbm [shape: f32[4,256,256], index: 1, kind: input, shape index: {}]   ;;  %s1796_s2 = inlined_call_operand.hbm [shape: f32[512,256], index: 2, kind: input, shape index: {}]   ;;  %s1797_s3 = inlined_call_operand.hbm [shape: f32[128,256], index: 3, kind: output, shape index: {}]  }
   0x1   :  { %1811 = sst [smem:[#allocation21_spill]] %s1795_s1 }
   0x2   :  { %1812 = sst [smem:[#allocation22_spill]] %s1797_s3 }
   0x3   :  { %8 = vsyncpa [#allocation4], 0 }
   0x4   :  { %10 = vsyncpa [#allocation4 + $0x1], 0 }
   0x5   :  { %11 = vsyncpa [#allocation7], 0 }
   0x6   :  { %13 = vsyncpa [#allocation7 + $0x1], 0 }
   0x7   :  { %14 = vsyncpa [#allocation5], 0 }
   0x8   :  { %16 = vsyncpa [#allocation5 + $0x1], 0  ;;  %s1364_s12 = smov 0   ;;  %s1366_s13 = smov 0  }
   0x9   :  { %s1368_s14 = smov 0   ;;  %s1370_s15 = smov 0  }
   0xa   :  { %s1372_s16 = smov 0   ;;  %s1374_s17 = smov 0  }
   0xb   :  { %s1376_s18 = smov 0   ;;  %s1378_s19 = smov 0  }
   0xc   :  { %s1380_s20 = smov 0   ;;  %s1382_s21 = smov 0  }
   0xd   :  { %s1384_s22 = smov 0  }
   0xe LB: > { %1813 = sst [smem:[#allocation13_spill]] %s1300_s14  ;;  %s1418_s23 = sadd.s32 4294967295, %s1332_s22   ;;  %s1332_s22 = sphi %s1384_s22, %s22_s22   ;;  %s1328_s21 = sphi %s1382_s21, %s1846_s21   ;;  %s1324_s20 = sphi %s1380_s20, %s1853_s20   ;;  %s1320_s19 = sphi %s1378_s19, %s1844_s19   ;;  %s1316_s18 = sphi %s1376_s18, %s1852_s18   ;;  %s1312_s17 = sphi %s1374_s17, %s1851_s17   ;;  %s1308_s16 = sphi %s1372_s16, %s1850_s16   ;;  %s1304_s15 = sphi %s1370_s15, %s1849_s15   ;;  %s1300_s14 = sphi %s1368_s14, %s1843_s14   ;;  %s1296_s13 = sphi %s1366_s13, %s1848_s13   ;;  %s1292_s12 = sphi %s1364_s12, %s1847_s12  }
   0xf   : > { %1814 = sst [smem:[#allocation14_spill]] %s1304_s15  ;;  %s31_s24 = sadd.s32 1, %s1324_s20 }
  0x10   : > { %1815 = sst [smem:[#allocation15_spill]] %s1316_s18  ;;  %p1421_p0 = scmp.ge.s32.totalorder %s31_s24, 4 }
  0x11   : > { %1816 = sst [smem:[#allocation16_spill]] %s1320_s19  ;;  %p49_p1 = scmp.eq.s32.totalorder %s1332_s22, 0 }
  0x12   : > { %1817 = sst [smem:[#allocation17_spill]] %s1328_s21  ;;  %p55_p2 = scmp.eq.s32.totalorder %s1418_s23, 0 }
  0x13   : > { %s67_s26 = sadd.s32 1, %s1300_s14  ;;  %s1855_s24 = smov (%p1421_p0, %s31_s24), 0 }
  0x14   : > { %1819 = sst [smem:[#allocation18_spill]] %s1855_s24  ;;  %p74_p3 = scmp.ne.s32.totalorder %s1300_s14, %s1296_s13 }
  0x15   : > { %p80_p4 = scmp.ne.s32.totalorder %s1296_s13, %s1292_s12  ;;  %s64_s27 = ssub.s32 %s1324_s20, %s1855_s24 }
  0x16   : > { %p65_p5 = scmp.eq.s32.totalorder %s64_s27, 0  ;;  %p76_p6 = por %p74_p3, %p49_p1 }
  0x17   : > { %p1441_p7 = por %p80_p4, %p55_p2  ;;  %p1799_p8 = scmp.lt.s32.totalorder %s1332_s22, 8 }
  0x18   : > { %s1447_s29 = scalar_select %p65_p5, %s1300_s14, %s67_s26  }
  0x19   : > { %s178_s30 = sand.u32 1, %s1332_s22   ;;  %s180_s4 = sand.u32 1, %s1300_s14  }
  0x1a   : > { %1821 = sst [smem:[#allocation19_spill]] %s1447_s29  ;;  %s939_s5 = sshll.u32 %s180_s4, 9 }
  0x1b   : > { %s969_s6 = sshll.u32 %s1324_s20, 13  ;;  %s1822_s1 = sld [smem:[#allocation21_spill]] }
  0x1c   : > { %s182_s10 = scalar_lea.vmem [#allocation6], %s939_s5  ;;  %p1457_p9 = pnand %p1799_p8, %p76_p6 }
  0x1d   : > { %s189_s11 = sshll.u32 %s182_s10, 4  ;;  %s942_s26 = sshll.u32 %s180_s4, 8  ;;  %s190_s11 = int_to_ptr.vmem [resolvable:$true] %s189_s11 }
  0x1e   : > { %p946_p10 = scmp.ge.s32.totalorder %s1332_s22, 1  ;;  %s1462_s27 = scalar_lea.sflag [#allocation7], %s178_s30 }
  0x1f   : > { %p1800_p11 = pneg %p1457_p9  ;;  %s1137_s24 = scalar_lea.vmem %s190_s11, 8192 }
  0x20   : > { %p1138_p12 = scmp.ne.s32.totalorder %s190_s11, %s1137_s24  ;;  %s1334_s5 = smov [#allocation6]  }
  0x21   : > { %s188_s9 = scalar_lea.hbm %s1822_s1, %s969_s6  ;;  %s1142_s6 = sshll.u32 %s1334_s5, 4  ;;  %s1143_s6 = int_to_ptr.vmem [resolvable:$false] %s1142_s6 }
  0x22   : > { %p1140_p13 = pnand %p1138_p12, %p1800_p11  ;;  %s1144_s7 = scalar_lea.vmem %s1143_s6, 16384 }
  0x23   : > { %p1145_p4 = scmp.lt.s32.totalorder %s190_s11, %s1143_s6  ;;  %p1146_p5 = scmp.lt.s32.totalorder %s1144_s7, %s1137_s24 }
  0x24   : > { %p1141_p3 = pneg %p1140_p13 }
  0x25   : > { %p1147_p6 = por %p1146_p5, %p1145_p4 }
  0x27   : > { %p1148_p8 = pnand %p1147_p6, %p1141_p3 }
  0x29   : > { %1151 = shalt.err (!%p1148_p8)
}
  0x2a   : > { %s1801_s4 = smov 256   ;;  %s1803_s24 = smov 16  }
  0x2b   : > { %988 = dma.hbm_to_vmem [thread:$0]  (!%p1457_p9), %s188_s9, 8192, %s190_s11, %s1462_s27, %s1801_s4, %s1801_s4, %s1803_s24  }
  0x2c   : > { %s203_s30 = scalar_lea.vmem [#allocation8], %s942_s26  ;;  %p219_p8 = scmp.lt.s32.totalorder %s1332_s22, 9 }
  0x2d   : > { %s211_s8 = sshll.u32 %s203_s30, 4  ;;  %s932_s5 = sadd.s32 4294967294, %s1332_s22   ;;  %s1534_s8 = int_to_ptr.vmem [resolvable:$true] %s211_s8 }
  0x2e   : > { %p1478_p12 = pnand %p946_p10, %p219_p8  ;;  %s34_s6 = sadd.s32 1, %s1328_s21 }
  0x2f   : > { %s41_s7 = sadd.s32 1, %s1312_s17  ;;  %s1857_s6 = smov (!%p1421_p0, %s34_s6), %s1328_s21 }
  0x30   : > { %p48_p13 = scmp.ne.s32.totalorder %s1312_s17, %s1308_s16  ;;  %p54_p3 = scmp.ne.s32.totalorder %s1308_s16, %s1304_s15 }
  0x31   : > { %p36_p4 = scmp.ge.s32.totalorder %s1857_s6, 2  ;;  %p130_p5 = scmp.eq.s32.totalorder %s1418_s23, 7 }
  0x32   : > { %p1495_p6 = por %p49_p1, %p48_p13  ;;  %p1501_p10 = por %p55_p2, %p54_p3 }
  0x33   : > { %s1859_s6 = smov (%p36_p4, %s1857_s6), 0  ;;  %p1507_p0 = por %p130_p5, %p48_p13 }
  0x34   : > { %1827 = sst [smem:[#allocation20_spill]] %s1859_s6  ;;  %p136_p8 = scmp.eq.s32.totalorder %s932_s5, 7 }
  0x35   : > { %s1828_s25 = scalar_select %p1507_p0, 1, 0 }
  0x36   : > { %s38_s26 = ssub.s32 %s1328_s21, %s1859_s6  ;;  %s156_s30 = sand.u32 1, %s1312_s17  }
  0x37   : > { %p39_p1 = scmp.eq.s32.totalorder %s38_s26, 0  ;;  %p1514_p11 = por %p136_p8, %p54_p3 }
  0x38   : > { %s935_s24 = sshll.u32 %s156_s30, 7  ;;  %s968_s29 = sshll.u32 %s1328_s21, 11 }
  0x39   : > { %s1829_s4 = scalar_select %p1514_p11, 1, 0 }
  0x3a   : > { %s1519_s1 = scalar_select %p39_p1, %s1312_s17, %s41_s7  }
  0x3b   : > { %s167_s3 = scalar_lea.hbm %s1794_s0, %s968_s29  ;;  %s160_s19 = scalar_lea.vmem [#allocation3], %s935_s24 }
  0x3c   : > { %s168_s18 = sshll.u32 %s160_s19, 4  ;;  %p1830_p2 = scmp.lt.s32.totalorder %s1332_s22, 8  ;;  %s169_s18 = int_to_ptr.vmem [resolvable:$true] %s168_s18 }
  0x3d   : > { %s971_s26 = sshll.u32 %s1324_s20, 12  ;;  %s157_s14 = scalar_lea.sflag [#allocation4], %s156_s30 }
  0x3e   : > { %p1529_p13 = pnand %p1830_p2, %p1495_p6  ;;  %s1539_s21 = scalar_lea.hbm %s1796_s2, %s971_s26 }
  0x3f   : > { %s1165_s15 = scalar_lea.vmem %s169_s18, 2048  ;;  %s1337_s19 = smov [#allocation3]  }
  0x40   : > { %p1154_p3 = pneg %p1529_p13  ;;  %p1166_p4 = scmp.ne.s32.totalorder %s169_s18, %s1165_s15 }
  0x41   : > { %s1170_s29 = sshll.u32 %s1337_s19, 4  ;;  %s1171_s29 = int_to_ptr.vmem [resolvable:$false] %s1170_s29 }
  0x42   : > { %p1168_p5 = pnand %p1166_p4, %p1154_p3  ;;  %s1172_s24 = scalar_lea.vmem %s1171_s29, 4096 }
  0x43   : > { %p1173_p6 = scmp.lt.s32.totalorder %s169_s18, %s1171_s29  ;;  %p1174_p1 = scmp.lt.s32.totalorder %s1172_s24, %s1165_s15 }
  0x44   : > { %p1169_p8 = pneg %p1168_p5 }
  0x45   : > { %p1175_p2 = por %p1174_p1, %p1173_p6 }
  0x47   : > { %p1176_p11 = pnand %p1175_p2, %p1169_p8 }
  0x49   : > { %1179 = shalt.err (!%p1176_p11)
}
  0x4a   : > { %s1832_s6 = smov 16   ;;  %s1833_s9 = smov 256  }
  0x4b   : > { %985 = dma.hbm_to_vmem [thread:$0]  (!%p1529_p13), %s167_s3, 2048, %s169_s18, %s157_s14, %s1833_s9, %s1833_s9, %s1832_s6  }
  0x4c   : > { %s1193_s30 = scalar_lea.vmem %s1534_s8, 4096  ;;  %p1834_p4 = pneg %p1457_p9 }
  0x4d   : > { %p1194_p3 = scmp.ne.s32.totalorder %s1534_s8, %s1193_s30  ;;  %s1338_s26 = smov [#allocation8]  }
  0x4e   : > { %s1198_s7 = sshll.u32 %s1338_s26, 4  ;;  %s1199_s7 = int_to_ptr.vmem [resolvable:$false] %s1198_s7 }
  0x4f   : > { %p1196_p5 = pnand %p1194_p3, %p1834_p4  ;;  %s1200_s15 = scalar_lea.vmem %s1199_s7, 8192 }
  0x50   : > { %p1201_p11 = scmp.lt.s32.totalorder %s1534_s8, %s1199_s7  ;;  %p1202_p8 = scmp.lt.s32.totalorder %s1200_s15, %s1193_s30 }
  0x51   : > { %p1197_p0 = pneg %p1196_p5 }
  0x52   : > { %p1203_p6 = por %p1202_p8, %p1201_p11 }
  0x54   : > { %p1204_p1 = pnand %p1203_p6, %p1197_p0 }
  0x56   : > { %1207 = shalt.err (!%p1204_p1)
}
  0x57   : > { %991 = dma.hbm_to_vmem [thread:$0]  (!%p1457_p9), %s1539_s21, 4096, %s1534_s8, %s1462_s27, %s1833_s9, %s1833_s9, %s1832_s6  }
  0x58   : > { %223 = sbr.rel (%p1478_p12) target bundleno = 678 (0x2a6), region = 32  ;;  %s1565_s3 = sand.u32 (!%p1478_p12), 1, %s1308_s16  }
  0x59   : > { %s947_s18 = sshll.u32 (!%p1478_p12), %s1565_s3, 7  ;;  %s226_s5 = scalar_lea.sflag (!%p1478_p12), [#allocation4], %s1565_s3 }
  0x5a   : > { %s1569_s14 = scalar_lea.vmem (!%p1478_p12), [#allocation3], %s947_s18 }
  0x5d   : > { %1279 = dma.done.wait (%p1501_p10), %s226_s5, 2048  }
  0x5e   : > { %1281 = vsyncadd (%p1501_p10), %s226_s5, 4294965248  ;;  %s234_s21 = sand.u32 1, %s1418_s23   ;;  %s236_s12 = sand.u32 1, %s1296_s13  }
  0x5f   : > { %s948_s27 = sshll.u32 %s236_s12, 9  ;;  %s235_s8 = scalar_lea.sflag [#allocation7], %s234_s21 }
  0x60   : > { %s1577_s10 = scalar_lea.vmem [#allocation6], %s948_s27 }
  0x61   : > { %1283 = dma.done.wait (%p1441_p7), %s235_s8, 12288  }
  0x62   : > { %1285 = vsyncadd (%p1441_p7), %s235_s8, 4294955008  ;;  %s949_s19 = sshll.u32 %s236_s12, 8  ;;  %s1585_s24 = scalar_lea.vmem [#allocation9], %s947_s18 }
  0x63   : > { %s1583_s29 = scalar_lea.vmem [#allocation8], %s949_s19  ;;  %s1835_s11 = sld [smem:[#allocation15_spill]] }
  0x69   : > { %p951_p9 = scmp.ne.s32.totalorder %s1835_s11, 0 }
  0x6b   : > { %286 = sbr.rel (%p951_p9) target bundleno = 121 (0x79), region = 48 }
  0x70   : > { %v1339_v0 = vmov 0.0  }
  0x71   : > { %287 = vst [vmem:[#allocation2 + $0x30] sm:$0xff] %v1339_v0  ;;  %288 = vst [vmem:[#allocation2] sm:$0xff] %v1339_v0 }
  0x72   : > { %289 = vst [vmem:[#allocation2 + $0x58] sm:$0xff] %v1339_v0  ;;  %290 = vst [vmem:[#allocation2 + $0x18] sm:$0xff] %v1339_v0 }
  0x73   : > { %291 = vst [vmem:[#allocation2 + $0x50] sm:$0xff] %v1339_v0  ;;  %292 = vst [vmem:[#allocation2 + $0x68] sm:$0xff] %v1339_v0 }
  0x74   : > { %293 = vst [vmem:[#allocation2 + $0x8] sm:$0xff] %v1339_v0  ;;  %294 = vst [vmem:[#allocation2 + $0x48] sm:$0xff] %v1339_v0 }
  0x75   : > { %295 = vst [vmem:[#allocation2 + $0x40] sm:$0xff] %v1339_v0  ;;  %296 = vst [vmem:[#allocation2 + $0x20] sm:$0xff] %v1339_v0 }
  0x76   : > { %297 = vst [vmem:[#allocation2 + $0x10] sm:$0xff] %v1339_v0  ;;  %298 = vst [vmem:[#allocation2 + $0x38] sm:$0xff] %v1339_v0 }
  0x77   : > { %299 = vst [vmem:[#allocation2 + $0x60] sm:$0xff] %v1339_v0  ;;  %300 = vst [vmem:[#allocation2 + $0x70] sm:$0xff] %v1339_v0 }
  0x78   : > { %301 = vst [vmem:[#allocation2 + $0x78] sm:$0xff] %v1339_v0  ;;  %302 = vst [vmem:[#allocation2 + $0x28] sm:$0xff] %v1339_v0 }
  0x79 PF: > { %v350_v1 = vld [vmem:[%s1577_s10 + $0xf8] sm:$0xff]  ;;  %v349_v2 = vld [vmem:[%s1577_s10 + $0xf0] sm:$0xff]  ;;  %v348_v3 = vld [vmem:[%s1577_s10 + $0xe8] sm:$0xff]  ;;  %s1836_s23 = sld [smem:[#allocation15_spill]] }
  0x7a   : > { %383 = vmatprep.subr.mxu0 %v350_v1  ;;  %v347_v4 = vld [vmem:[%s1577_s10 + $0xe0] sm:$0xff]  ;;  %v346_v5 = vld [vmem:[%s1577_s10 + $0xd8] sm:$0xff]  ;;  %v345_v6 = vld [vmem:[%s1577_s10 + $0xd0] sm:$0xff] }
  0x7b   : > { %384 = vmatpush1.msra.mxu0 %v349_v2  ;;  %v344_v7 = vld [vmem:[%s1577_s10 + $0xc8] sm:$0xff]  ;;  %v343_v8 = vld [vmem:[%s1577_s10 + $0xc0] sm:$0xff]  ;;  %v342_v9 = vld [vmem:[%s1577_s10 + $0xb8] sm:$0xff] }
  0x7c   : > { %385 = vmatprep.subr.mxu0 %v348_v3  ;;  %v341_v10 = vld [vmem:[%s1577_s10 + $0xb0] sm:$0xff]  ;;  %v340_v11 = vld [vmem:[%s1577_s10 + $0xa8] sm:$0xff]  ;;  %v339_v12 = vld [vmem:[%s1577_s10 + $0xa0] sm:$0xff] }
  0x7d   : > { %386 = vmatpush1.msra.mxu0 %v347_v4  ;;  %v338_v13 = vld [vmem:[%s1577_s10 + $0x98] sm:$0xff]  ;;  %v337_v14 = vld [vmem:[%s1577_s10 + $0x90] sm:$0xff]  ;;  %v336_v15 = vld [vmem:[%s1577_s10 + $0x88] sm:$0xff] }
  0x7e   : > { %387 = vmatprep.subr.mxu0 %v346_v5  ;;  %v335_v16 = vld [vmem:[%s1577_s10 + $0x80] sm:$0xff]  ;;  %v334_v17 = vld [vmem:[%s1577_s10 + $0x78] sm:$0xff]  ;;  %v333_v18 = vld [vmem:[%s1577_s10 + $0x70] sm:$0xff] }
  0x7f   : > { %388 = vmatpush1.msra.mxu0 %v345_v6  ;;  %v332_v19 = vld [vmem:[%s1577_s10 + $0x68] sm:$0xff]  ;;  %v331_v20 = vld [vmem:[%s1577_s10 + $0x60] sm:$0xff]  ;;  %v330_v21 = vld [vmem:[%s1577_s10 + $0x58] sm:$0xff]  ;;  %p960_p7 = scmp.ne.s32.totalorder %s1836_s23, 3 }
  0x80   : > { %389 = vmatprep.subr.mxu0 %v344_v7  ;;  %v329_v22 = vld [vmem:[%s1577_s10 + $0x50] sm:$0xff]  ;;  %v328_v23 = vld [vmem:[%s1577_s10 + $0x48] sm:$0xff]  ;;  %v327_v24 = vld [vmem:[%s1577_s10 + $0x40] sm:$0xff] }
  0x81   : > { %390 = vmatpush1.msra.mxu0 %v343_v8  ;;  %v304_v25 = vld [vmem:[%s1569_s14 + $0x8] sm:$0xff]  ;;  %v326_v26 = vld [vmem:[%s1577_s10 + $0x38] sm:$0xff]  ;;  %v325_v27 = vld [vmem:[%s1577_s10 + $0x30] sm:$0xff] }
  0x82   : > { %391 = vmatprep.subr.mxu0 %v342_v9  ;;  %447 = vmatprep.mubr.f32.mxu0 %v304_v25  ;;  %v324_v28 = vld [vmem:[%s1577_s10 + $0x28] sm:$0xff]  ;;  %v323_v29 = vld [vmem:[%s1577_s10 + $0x20] sm:$0xff]  ;;  %v322_v30 = vld [vmem:[%s1577_s10 + $0x18] sm:$0xff] }
  0x83   : > { %392 = vmatpush1.msra.mxu0 %v341_v10  ;;  %v321_v31 = vld [vmem:[%s1577_s10 + $0x10] sm:$0xff]  ;;  %v320_v32 = vld [vmem:[%s1577_s10 + $0x8] sm:$0xff]  ;;  %v319_v33 = vld [vmem:[%s1577_s10] sm:$0xff] }
  0x84   : > { %393 = vmatprep.subr.mxu0 %v340_v11  ;;  %v382_v34 = vld [vmem:[%s1577_s10 + $0x1f8] sm:$0xff]  ;;  %v381_v35 = vld [vmem:[%s1577_s10 + $0x1f0] sm:$0xff]  ;;  %v380_v36 = vld [vmem:[%s1577_s10 + $0x1e8] sm:$0xff] }
  0x85   : > { %394 = vmatpush1.msra.mxu0 %v339_v12  ;;  %v379_v37 = vld [vmem:[%s1577_s10 + $0x1e0] sm:$0xff]  ;;  %v378_v38 = vld [vmem:[%s1577_s10 + $0x1d8] sm:$0xff]  ;;  %v377_v39 = vld [vmem:[%s1577_s10 + $0x1d0] sm:$0xff] }
  0x86   : > { %395 = vmatprep.subr.mxu0 %v338_v13  ;;  %v376_v40 = vld [vmem:[%s1577_s10 + $0x1c8] sm:$0xff]  ;;  %v375_v41 = vld [vmem:[%s1577_s10 + $0x1c0] sm:$0xff]  ;;  %v374_v42 = vld [vmem:[%s1577_s10 + $0x1b8] sm:$0xff] }
  0x87   : > { %396 = vmatpush1.msra.mxu0 %v337_v14  ;;  %v373_v43 = vld [vmem:[%s1577_s10 + $0x1b0] sm:$0xff]  ;;  %v372_v44 = vld [vmem:[%s1577_s10 + $0x1a8] sm:$0xff]  ;;  %v371_v45 = vld [vmem:[%s1577_s10 + $0x1a0] sm:$0xff] }
  0x88   : > { %397 = vmatprep.subr.mxu0 %v336_v15  ;;  %v370_v46 = vld [vmem:[%s1577_s10 + $0x198] sm:$0xff]  ;;  %v369_v47 = vld [vmem:[%s1577_s10 + $0x190] sm:$0xff]  ;;  %v368_v48 = vld [vmem:[%s1577_s10 + $0x188] sm:$0xff] }
  0x89   : > { %398 = vmatpush1.msra.mxu0 %v335_v16  ;;  %v367_v49 = vld [vmem:[%s1577_s10 + $0x180] sm:$0xff]  ;;  %v366_v50 = vld [vmem:[%s1577_s10 + $0x178] sm:$0xff]  ;;  %v365_v51 = vld [vmem:[%s1577_s10 + $0x170] sm:$0xff] }
  0x8a   : > { %399 = vmatprep.subr.mxu0 %v334_v17  ;;  %v364_v52 = vld [vmem:[%s1577_s10 + $0x168] sm:$0xff]  ;;  %v363_v53 = vld [vmem:[%s1577_s10 + $0x160] sm:$0xff]  ;;  %v362_v54 = vld [vmem:[%s1577_s10 + $0x158] sm:$0xff] }
  0x8b   : > { %400 = vmatpush1.msra.mxu0 %v333_v18  ;;  %v361_v55 = vld [vmem:[%s1577_s10 + $0x150] sm:$0xff]  ;;  %v360_v56 = vld [vmem:[%s1577_s10 + $0x148] sm:$0xff]  ;;  %v359_v57 = vld [vmem:[%s1577_s10 + $0x140] sm:$0xff] }
  0x8c   : > { %401 = vmatprep.subr.mxu0 %v332_v19  ;;  %v358_v58 = vld [vmem:[%s1577_s10 + $0x138] sm:$0xff]  ;;  %v357_v59 = vld [vmem:[%s1577_s10 + $0x130] sm:$0xff]  ;;  %v356_v60 = vld [vmem:[%s1577_s10 + $0x128] sm:$0xff] }
  0x8d   : > { %402 = vmatpush1.msra.mxu0 %v331_v20  ;;  %v355_v61 = vld [vmem:[%s1577_s10 + $0x120] sm:$0xff]  ;;  %v354_v62 = vld [vmem:[%s1577_s10 + $0x118] sm:$0xff]  ;;  %v353_v63 = vld [vmem:[%s1577_s10 + $0x110] sm:$0xff] }
  0x8e   : > { %403 = vmatprep.subr.mxu0 %v330_v21  ;;  %v352_v0 = vld [vmem:[%s1577_s10 + $0x108] sm:$0xff]  ;;  %v351_v1 = vld [vmem:[%s1577_s10 + $0x100] sm:$0xff]  ;;  %v306_v3 = vld [vmem:[%s1569_s14 + $0x18] sm:$0xff] }
  0x8f   : > { %404 = vmatpush1.msra.mxu0 %v329_v22  ;;  %v303_v2 = vld [vmem:[%s1569_s14] sm:$0xff]  ;;  %v305_v4 = vld [vmem:[%s1569_s14 + $0x10] sm:$0xff]  ;;  %v308_v5 = vld [vmem:[%s1569_s14 + $0x28] sm:$0xff] }
  0x90   : > { %405 = vmatprep.subr.mxu0 %v328_v23  ;;  %v307_v6 = vld [vmem:[%s1569_s14 + $0x20] sm:$0xff]  ;;  %v310_v7 = vld [vmem:[%s1569_s14 + $0x38] sm:$0xff]  ;;  %v309_v8 = vld [vmem:[%s1569_s14 + $0x30] sm:$0xff] }
  0x91   : > { %406 = vmatpush1.msra.mxu0 %v327_v24  ;;  %v312_v9 = vld [vmem:[%s1569_s14 + $0x48] sm:$0xff]  ;;  %v311_v10 = vld [vmem:[%s1569_s14 + $0x40] sm:$0xff]  ;;  %v314_v11 = vld [vmem:[%s1569_s14 + $0x58] sm:$0xff] }
  0x92   : > { %407 = vmatprep.subr.mxu0 %v326_v26  ;;  %v313_v12 = vld [vmem:[%s1569_s14 + $0x50] sm:$0xff]  ;;  %v316_v13 = vld [vmem:[%s1569_s14 + $0x68] sm:$0xff]  ;;  %v315_v14 = vld [vmem:[%s1569_s14 + $0x60] sm:$0xff] }
  0x93   : > { %408 = vmatpush1.msra.mxu0 %v325_v27  ;;  %v318_v15 = vld [vmem:[%s1569_s14 + $0x78] sm:$0xff]  ;;  %v317_v16 = vld [vmem:[%s1569_s14 + $0x70] sm:$0xff]  ;;  %v605_v19 = vld [vmem:[%s1583_s29 + $0xe8] sm:$0xff] }
  0x94   : > { %409 = vmatprep.subr.mxu0 %v324_v28  ;;  %v607_v17 = vld [vmem:[%s1583_s29 + $0xf8] sm:$0xff]  ;;  %v606_v18 = vld [vmem:[%s1583_s29 + $0xf0] sm:$0xff]  ;;  %v604_v20 = vld [vmem:[%s1583_s29 + $0xe0] sm:$0xff] }
  0x95   : > { %410 = vmatpush1.msra.mxu0 %v323_v29  ;;  %608 = vmatprep.subr.mxu1 %v607_v17  ;;  %v603_v21 = vld [vmem:[%s1583_s29 + $0xd8] sm:$0xff]  ;;  %v602_v22 = vld [vmem:[%s1583_s29 + $0xd0] sm:$0xff]  ;;  %v601_v23 = vld [vmem:[%s1583_s29 + $0xc8] sm:$0xff] }
  0x96   : > { %411 = vmatprep.subr.mxu0 %v322_v30  ;;  %609 = vmatpush1.msra.mxu1 %v606_v18  ;;  %v600_v24 = vld [vmem:[%s1583_s29 + $0xc0] sm:$0xff]  ;;  %v599_v25 = vld [vmem:[%s1583_s29 + $0xb8] sm:$0xff]  ;;  %v598_v26 = vld [vmem:[%s1583_s29 + $0xb0] sm:$0xff] }
  0x97   : > { %412 = vmatpush1.msra.mxu0 %v321_v31  ;;  %610 = vmatprep.subr.mxu1 %v605_v19  ;;  %v597_v27 = vld [vmem:[%s1583_s29 + $0xa8] sm:$0xff]  ;;  %v596_v28 = vld [vmem:[%s1583_s29 + $0xa0] sm:$0xff]  ;;  %v595_v29 = vld [vmem:[%s1583_s29 + $0x98] sm:$0xff] }
  0x98   : > { %413 = vmatprep.subr.mxu0 %v320_v32  ;;  %611 = vmatpush1.msra.mxu1 %v604_v20  ;;  %v594_v30 = vld [vmem:[%s1583_s29 + $0x90] sm:$0xff]  ;;  %v593_v31 = vld [vmem:[%s1583_s29 + $0x88] sm:$0xff]  ;;  %v592_v32 = vld [vmem:[%s1583_s29 + $0x80] sm:$0xff] }
  0x99   : > { %414 = vmatpush1.msra.mxu0 %v319_v33  ;;  %612 = vmatprep.subr.mxu1 %v603_v21  ;;  %v591_v33 = vld [vmem:[%s1583_s29 + $0x78] sm:$0xff] }
  0x9a   : > { %415 = vmatprep.subr.mxu0 %v382_v34  ;;  %613 = vmatpush1.msra.mxu1 %v602_v22  ;;  %v590_v34 = vld [vmem:[%s1583_s29 + $0x70] sm:$0xff] }
  0x9b   : > { %416 = vmatpush2.msra.mxu0 %v381_v35  ;;  %614 = vmatprep.subr.mxu1 %v601_v23  ;;  %v589_v35 = vld [vmem:[%s1583_s29 + $0x68] sm:$0xff] }
  0x9c   : > { %417 = vmatprep.subr.mxu0 %v380_v36  ;;  %615 = vmatpush1.msra.mxu1 %v600_v24  ;;  %v588_v36 = vld [vmem:[%s1583_s29 + $0x60] sm:$0xff] }
  0x9d   : > { %418 = vmatpush2.msra.mxu0 %v379_v37  ;;  %616 = vmatprep.subr.mxu1 %v599_v25  ;;  %v587_v37 = vld [vmem:[%s1583_s29 + $0x58] sm:$0xff] }
  0x9e   : > { %419 = vmatprep.subr.mxu0 %v378_v38  ;;  %617 = vmatpush1.msra.mxu1 %v598_v26  ;;  %v586_v38 = vld [vmem:[%s1583_s29 + $0x50] sm:$0xff] }
  0x9f   : > { %420 = vmatpush2.msra.mxu0 %v377_v39  ;;  %618 = vmatprep.subr.mxu1 %v597_v27  ;;  %v585_v39 = vld [vmem:[%s1583_s29 + $0x48] sm:$0xff] }
  0xa0   : > { %421 = vmatprep.subr.mxu0 %v376_v40  ;;  %619 = vmatpush1.msra.mxu1 %v596_v28  ;;  %v584_v40 = vld [vmem:[%s1583_s29 + $0x40] sm:$0xff] }
  0xa1   : > { %422 = vmatpush2.msra.mxu0 %v375_v41  ;;  %620 = vmatprep.subr.mxu1 %v595_v29  ;;  %v583_v41 = vld [vmem:[%s1583_s29 + $0x38] sm:$0xff] }
  0xa2   : > { %423 = vmatprep.subr.mxu0 %v374_v42  ;;  %621 = vmatpush1.msra.mxu1 %v594_v30  ;;  %v582_v42 = vld [vmem:[%s1583_s29 + $0x30] sm:$0xff] }
  0xa3   : > { %424 = vmatpush2.msra.mxu0 %v373_v43  ;;  %622 = vmatprep.subr.mxu1 %v593_v31  ;;  %v581_v43 = vld [vmem:[%s1583_s29 + $0x28] sm:$0xff] }
  0xa4   : > { %425 = vmatprep.subr.mxu0 %v372_v44  ;;  %623 = vmatpush1.msra.mxu1 %v592_v32  ;;  %v580_v44 = vld [vmem:[%s1583_s29 + $0x20] sm:$0xff] }
  0xa5   : > { %426 = vmatpush2.msra.mxu0 %v371_v45  ;;  %624 = vmatprep.subr.mxu1 %v591_v33  ;;  %v579_v45 = vld [vmem:[%s1583_s29 + $0x18] sm:$0xff] }
  0xa6   : > { %427 = vmatprep.subr.mxu0 %v370_v46  ;;  %625 = vmatpush1.msra.mxu1 %v590_v34  ;;  %v578_v46 = vld [vmem:[%s1583_s29 + $0x10] sm:$0xff] }
  0xa7   : > { %428 = vmatpush2.msra.mxu0 %v369_v47  ;;  %626 = vmatprep.subr.mxu1 %v589_v35  ;;  %v577_v47 = vld [vmem:[%s1583_s29 + $0x8] sm:$0xff] }
  0xa8   : > { %429 = vmatprep.subr.mxu0 %v368_v48  ;;  %627 = vmatpush1.msra.mxu1 %v588_v36  ;;  %v576_v48 = vld [vmem:[%s1583_s29] sm:$0xff] }
  0xa9   : > { %430 = vmatpush2.msra.mxu0 %v367_v49  ;;  %628 = vmatprep.subr.mxu1 %v587_v37  ;;  %v1340_v49 = vmov 0.0  }
  0xaa   : > { %431 = vmatprep.subr.mxu0 %v366_v50  ;;  %629 = vmatpush1.msra.mxu1 %v586_v38 }
  0xab   : > { %432 = vmatpush2.msra.mxu0 %v365_v51  ;;  %630 = vmatprep.subr.mxu1 %v585_v39 }
  0xac   : > { %433 = vmatprep.subr.mxu0 %v364_v52  ;;  %631 = vmatpush1.msra.mxu1 %v584_v40 }
  0xad   : > { %434 = vmatpush2.msra.mxu0 %v363_v53  ;;  %632 = vmatprep.subr.mxu1 %v583_v41 }
  0xae   : > { %435 = vmatprep.subr.mxu0 %v362_v54  ;;  %633 = vmatpush1.msra.mxu1 %v582_v42 }
  0xaf   : > { %436 = vmatpush2.msra.mxu0 %v361_v55  ;;  %634 = vmatprep.subr.mxu1 %v581_v43 }
  0xb0   : > { %437 = vmatprep.subr.mxu0 %v360_v56  ;;  %635 = vmatpush1.msra.mxu1 %v580_v44 }
  0xb1   : > { %438 = vmatpush2.msra.mxu0 %v359_v57  ;;  %636 = vmatprep.subr.mxu1 %v579_v45 }
  0xb2   : > { %439 = vmatprep.subr.mxu0 %v358_v58  ;;  %637 = vmatpush1.msra.mxu1 %v578_v46 }
  0xb3   : > { %440 = vmatpush2.msra.mxu0 %v357_v59  ;;  %638 = vmatprep.subr.mxu1 %v577_v47 }
  0xb4   : > { %441 = vmatprep.subr.mxu0 %v356_v60  ;;  %639 = vmatpush1.msra.mxu1 %v576_v48 }
  0xb5   : > { %442 = vmatpush2.msra.mxu0 %v355_v61  ;;  %672 = vmatprep.mubr.f32.mxu1 %v1340_v49 }
  0xb6   : > { %443 = vmatprep.subr.mxu0 %v354_v62 }
  0xb7   : > { %444 = vmatpush2.msra.mxu0 %v353_v63 }
  0xb8   : > { %445 = vmatprep.subr.mxu0 %v352_v0 }
  0xb9   : > { %446 = vmatpush2.msra.mxu0 %v351_v1 }
  0xba   : > { %448 = vmatmul.mubr.f32.vlgmr.msra.gmra.mxu0 %v303_v2 }
  0xbb   : > { %453 = vmatprep.mubr.f32.mxu0 %v306_v3 }
  0xbe   : > { %454 = vmatmul.mubr.f32.gmra.mxu0 %v305_v4 }
  0xbf   : > { %459 = vmatprep.mubr.f32.mxu0 %v308_v5 }
  0xc2   : > { %460 = vmatmul.mubr.f32.gmra.mxu0 %v307_v6 }
  0xc3   : > { %465 = vmatprep.mubr.f32.mxu0 %v310_v7 }
  0xc6   : > { %466 = vmatmul.mubr.f32.gmra.mxu0 %v309_v8 }
  0xc7   : > { %471 = vmatprep.mubr.f32.mxu0 %v312_v9 }
  0xca   : > { %472 = vmatmul.mubr.f32.gmra.mxu0 %v311_v10 }
  0xcb   : > { %477 = vmatprep.mubr.f32.mxu0 %v314_v11 }
  0xce   : > { %478 = vmatmul.mubr.f32.gmra.mxu0 %v313_v12 }
  0xcf   : > { %483 = vmatprep.mubr.f32.mxu0 %v316_v13 }
  0xd2   : > { %484 = vmatmul.mubr.f32.gmra.mxu0 %v315_v14 }
  0xd3   : > { %489 = vmatprep.mubr.f32.mxu0 %v318_v15 }
  0xd6   : > { %490 = vmatmul.mubr.f32.gmra.mxu0 %v317_v16 }
 0x17a   : > { %v449_v50 = vpop.f32.mrf.mxu0 }
 0x17b   : > { %v952_v51 = vmul.f32 -1.442695, %v449_v50 }
 0x17c   : > { %v451_v52 = vpop.f32.mrf.mxu0 }
 0x17d   : > { %1092 = vpow2.f32 %v952_v51  ;;  %v560_v51 = vld [vmem:[#allocation2 + $0x30] sm:$0xff] }
 0x17e   : > { %v455_v53 = vpop.f32.mrf.mxu0 }
 0x17f   : > { %v953_v54 = vmul.f32 -1.442695, %v455_v53 }
 0x180   : > { %v457_v55 = vpop.f32.mrf.mxu0 }
 0x181   : > { %1094 = vpow2.f32 %v953_v54 }
 0x182   : > { %v461_v56 = vpop.f32.mrf.mxu0 }
 0x183   : > { %v954_v57 = vmul.f32 -1.442695, %v461_v56 }
 0x184   : > { %v463_v58 = vpop.f32.mrf.mxu0 }
 0x185   : > { %1096 = vpow2.f32 %v954_v57 }
 0x186   : > { %v467_v59 = vpop.f32.mrf.mxu0 }
 0x187   : > { %v955_v60 = vmul.f32 -1.442695, %v467_v59 }
 0x188   : > { %v469_v61 = vpop.f32.mrf.mxu0 }
 0x189   : > { %1098 = vpow2.f32 %v955_v60 }
 0x18a   : > { %v1093_v62 = vpop.eup %1092  ;;  %v473_v63 = vpop.f32.mrf.mxu0 }
 0x18b   : > { %v520_v0 = vadd.f32 1.0, %v1093_v62  ;;  %v956_v1 = vmul.f32 -1.442695, %v473_v63  ;;  %v564_v62 = vld [vmem:[#allocation2 + $0x50] sm:$0xff] }
 0x18c   : > { %v475_v2 = vpop.f32.mrf.mxu0 }
 0x18d   : > { %1100 = vrcp.f32 %v520_v0 }
 0x18e   : > { %v1095_v3 = vpop.eup %1094  ;;  %1102 = vpow2.f32 %v956_v1  ;;  %v479_v4 = vpop.f32.mrf.mxu0 }
 0x18f   : > { %v521_v5 = vadd.f32 1.0, %v1095_v3  ;;  %v957_v6 = vmul.f32 -1.442695, %v479_v4  ;;  %v566_v3 = vld [vmem:[#allocation2 + $0x8] sm:$0xff] }
 0x190   : > { %v481_v7 = vpop.f32.mrf.mxu0 }
 0x191   : > { %1104 = vrcp.f32 %v521_v5 }
 0x192   : > { %v1097_v8 = vpop.eup %1096  ;;  %1106 = vpow2.f32 %v957_v6  ;;  %v485_v9 = vpop.f32.mrf.mxu0  ;;  %v567_v6 = vld [vmem:[#allocation2 + $0x48] sm:$0xff] }
 0x193   : > { %v522_v10 = vadd.f32 1.0, %v1097_v8  ;;  %v958_v11 = vmul.f32 -1.442695, %v485_v9 }
 0x194   : > { %v487_v12 = vpop.f32.mrf.mxu0 }
 0x195   : > { %1108 = vrcp.f32 %v522_v10  ;;  %v568_v10 = vld [vmem:[#allocation2 + $0x40] sm:$0xff] }
 0x196   : > { %v1099_v13 = vpop.eup %1098  ;;  %1110 = vpow2.f32 %v958_v11  ;;  %v491_v14 = vpop.f32.mrf.mxu0 }
 0x197   : > { %v523_v15 = vadd.f32 1.0, %v1099_v13  ;;  %v959_v16 = vmul.f32 -1.442695, %v491_v14 }
 0x198   : > { %v493_v48 = vpop.f32.mrf.mxu0 }
 0x199   : > { %1112 = vrcp.f32 %v523_v15  ;;  %v570_v15 = vld [vmem:[#allocation2 + $0x10] sm:$0xff] }
 0x19a   : > { %v1101_v17 = vpop.eup %1100  ;;  %1114 = vpow2.f32 %v959_v16 }
 0x19b   : > { %v1103_v18 = vpop.eup %1102  ;;  %v544_v19 = vmul.f32 %v1101_v17, %v449_v50 }
 0x19c   : > { %v524_v20 = vadd.f32 1.0, %v1103_v18  ;;  %v571_v18 = vld [vmem:[#allocation2 + $0x38] sm:$0xff] }
 0x19d   : > { %v552_v21 = vmul.f32 %v544_v19, %v451_v52 }
 0x19e   : > { %v1105_v22 = vpop.eup %1104  ;;  %1116 = vrcp.f32 %v524_v20 }
 0x19f   : > { %v1107_v23 = vpop.eup %1106  ;;  %v545_v24 = vmul.f32 %v1105_v22, %v455_v53  ;;  %673 = vmatmul.mubr.f32.vlgmr.msra.gmra.mxu1 %v552_v21  ;;  %v561_v53 = vld [vmem:[#allocation2] sm:$0xff] }
 0x1a0   : > { %v525_v25 = vadd.f32 1.0, %v1107_v23  ;;  %678 = vmatprep.mubr.f32.mxu1 %v1340_v49  ;;  %v572_v21 = vld [vmem:[#allocation2 + $0x60] sm:$0xff] }
 0x1a1   : > { %v553_v26 = vmul.f32 %v545_v24, %v457_v55  ;;  %v573_v24 = vld [vmem:[#allocation2 + $0x70] sm:$0xff] }
 0x1a2   : > { %v1109_v27 = vpop.eup %1108  ;;  %1118 = vrcp.f32 %v525_v25 }
 0x1a3   : > { %v1111_v28 = vpop.eup %1110  ;;  %v546_v29 = vmul.f32 %v1109_v27, %v461_v56  ;;  %679 = vmatmul.mubr.f32.gmra.mxu1 %v553_v26  ;;  %v562_v56 = vld [vmem:[#allocation2 + $0x58] sm:$0xff] }
 0x1a4   : > { %v526_v30 = vadd.f32 1.0, %v1111_v28  ;;  %684 = vmatprep.mubr.f32.mxu1 %v1340_v49  ;;  %v574_v27 = vld [vmem:[#allocation2 + $0x78] sm:$0xff] }
 0x1a5   : > { %v554_v31 = vmul.f32 %v546_v29, %v463_v58 }
 0x1a6   : > { %v1113_v32 = vpop.eup %1112  ;;  %1120 = vrcp.f32 %v526_v30  ;;  %v575_v30 = vld [vmem:[#allocation2 + $0x28] sm:$0xff] }
 0x1a7   : > { %v1115_v33 = vpop.eup %1114  ;;  %v547_v34 = vmul.f32 %v1113_v32, %v467_v59  ;;  %685 = vmatmul.mubr.f32.gmra.mxu1 %v554_v31  ;;  %v563_v59 = vld [vmem:[#allocation2 + $0x18] sm:$0xff] }
 0x1a8   : > { %v527_v35 = vadd.f32 1.0, %v1115_v33  ;;  %690 = vmatprep.mubr.f32.mxu1 %v1340_v49 }
 0x1a9   : > { %v555_v36 = vmul.f32 %v547_v34, %v469_v61 }
 0x1aa   : > { %1122 = vrcp.f32 %v527_v35 }
 0x1ab   : > { %v1117_v37 = vpop.eup %1116  ;;  %691 = vmatmul.mubr.f32.gmra.mxu1 %v555_v36 }
 0x1ac   : > { %v548_v38 = vmul.f32 %v1117_v37, %v473_v63  ;;  %696 = vmatprep.mubr.f32.mxu1 %v1340_v49 }
 0x1ae   : > { %v556_v39 = vmul.f32 %v548_v38, %v475_v2 }
 0x1af   : > { %v1119_v40 = vpop.eup %1118 }
 0x1b0   : > { %v549_v41 = vmul.f32 %v1119_v40, %v479_v4  ;;  %697 = vmatmul.mubr.f32.gmra.mxu1 %v556_v39 }
 0x1b1   : > { %702 = vmatprep.mubr.f32.mxu1 %v1340_v49 }
 0x1b2   : > { %v557_v42 = vmul.f32 %v549_v41, %v481_v7 }
 0x1b3   : > { %v1121_v43 = vpop.eup %1120 }
 0x1b4   : > { %v550_v44 = vmul.f32 %v1121_v43, %v485_v9  ;;  %703 = vmatmul.mubr.f32.gmra.mxu1 %v557_v42 }
 0x1b5   : > { %708 = vmatprep.mubr.f32.mxu1 %v1340_v49 }
 0x1b6   : > { %v558_v45 = vmul.f32 %v550_v44, %v487_v12  ;;  %v569_v12 = vld [vmem:[#allocation2 + $0x20] sm:$0xff] }
 0x1b7   : > { %v1123_v46 = vpop.eup %1122 }
 0x1b8   : > { %v551_v47 = vmul.f32 %v1123_v46, %v491_v14  ;;  %709 = vmatmul.mubr.f32.gmra.mxu1 %v558_v45 }
 0x1b9   : > { %714 = vmatprep.mubr.f32.mxu1 %v1340_v49  ;;  %v565_v49 = vld [vmem:[#allocation2 + $0x68] sm:$0xff] }
 0x1ba   : > { %v559_v50 = vmul.f32 %v551_v47, %v493_v48 }
 0x1bc   : > { %715 = vmatmul.mubr.f32.gmra.mxu1 %v559_v50 }
 0x25f   : > { %v674_v52 = vpop.f32.mrf.mxu1 }
 0x260   : > { %v721_v54 = vadd.f32 %v674_v52, %v560_v51 }
 0x261   : > { %v676_v55 = vpop.f32.mrf.mxu1 }
 0x262   : > { %737 = vst [vmem:[#allocation2 + $0x30] sm:$0xff] %v721_v54  ;;  %v722_v57 = vadd.f32 %v676_v55, %v561_v53 }
 0x263   : > { %v680_v58 = vpop.f32.mrf.mxu1 }
 0x264   : > { %738 = vst [vmem:[#allocation2] sm:$0xff] %v722_v57  ;;  %v723_v60 = vadd.f32 %v680_v58, %v562_v56 }
 0x265   : > { %v682_v61 = vpop.f32.mrf.mxu1 }
 0x266   : > { %739 = vst [vmem:[#allocation2 + $0x58] sm:$0xff] %v723_v60  ;;  %v724_v63 = vadd.f32 %v682_v61, %v563_v59 }
 0x267   : > { %v686_v0 = vpop.f32.mrf.mxu1 }
 0x268   : > { %740 = vst [vmem:[#allocation2 + $0x18] sm:$0xff] %v724_v63  ;;  %v725_v1 = vadd.f32 %v686_v0, %v564_v62 }
 0x269   : > { %v688_v2 = vpop.f32.mrf.mxu1 }
 0x26a   : > { %741 = vst [vmem:[#allocation2 + $0x50] sm:$0xff] %v725_v1  ;;  %v726_v4 = vadd.f32 %v688_v2, %v565_v49 }
 0x26b   : > { %v692_v5 = vpop.f32.mrf.mxu1 }
 0x26c   : > { %742 = vst [vmem:[#allocation2 + $0x68] sm:$0xff] %v726_v4  ;;  %v727_v7 = vadd.f32 %v692_v5, %v566_v3 }
 0x26d   : > { %v694_v8 = vpop.f32.mrf.mxu1 }
 0x26e   : > { %743 = vst [vmem:[#allocation2 + $0x8] sm:$0xff] %v727_v7  ;;  %v728_v9 = vadd.f32 %v694_v8, %v567_v6 }
 0x270   : > { %744 = vst [vmem:[#allocation2 + $0x48] sm:$0xff] %v728_v9  ;;  %v698_v11 = vpop.f32.mrf.mxu1 }
 0x271   : > { %v729_v13 = vadd.f32 %v698_v11, %v568_v10 }
 0x272   : > { %v700_v14 = vpop.f32.mrf.mxu1 }
 0x273   : > { %745 = vst [vmem:[#allocation2 + $0x40] sm:$0xff] %v729_v13  ;;  %v730_v16 = vadd.f32 %v700_v14, %v569_v12 }
 0x274   : > { %v704_v17 = vpop.f32.mrf.mxu1 }
 0x275   : > { %746 = vst [vmem:[#allocation2 + $0x20] sm:$0xff] %v730_v16  ;;  %v731_v19 = vadd.f32 %v704_v17, %v570_v15 }
 0x276   : > { %v706_v20 = vpop.f32.mrf.mxu1 }
 0x277   : > { %747 = vst [vmem:[#allocation2 + $0x10] sm:$0xff] %v731_v19  ;;  %v732_v22 = vadd.f32 %v706_v20, %v571_v18 }
 0x278   : > { %v710_v23 = vpop.f32.mrf.mxu1 }
 0x279   : > { %748 = vst [vmem:[#allocation2 + $0x38] sm:$0xff] %v732_v22  ;;  %v733_v25 = vadd.f32 %v710_v23, %v572_v21 }
 0x27a   : > { %v712_v26 = vpop.f32.mrf.mxu1 }
 0x27b   : > { %749 = vst [vmem:[#allocation2 + $0x60] sm:$0xff] %v733_v25  ;;  %v734_v28 = vadd.f32 %v712_v26, %v573_v24 }
 0x27c   : > { %v716_v29 = vpop.f32.mrf.mxu1 }
 0x27d   : > { %750 = vst [vmem:[#allocation2 + $0x70] sm:$0xff] %v734_v28  ;;  %v735_v31 = vadd.f32 %v716_v29, %v574_v27  ;;  %756 = sbr.rel (%p960_p7) target bundleno = 651 (0x28b), region = 52 }
 0x27e   : > { %v718_v32 = vpop.f32.mrf.mxu1 }
 0x27f   : > { %751 = vst [vmem:[#allocation2 + $0x78] sm:$0xff] %v735_v31  ;;  %v736_v33 = vadd.f32 %v718_v32, %v575_v30 }
 0x281   : > { %752 = vst [vmem:[#allocation2 + $0x28] sm:$0xff] %v736_v33 }
 0x282   : > { %v757_v34 = vld [vmem:[#allocation2 + $0x30] sm:$0xff]  ;;  %v758_v35 = vld [vmem:[#allocation2] sm:$0xff]  ;;  %v759_v36 = vld [vmem:[#allocation2 + $0x58] sm:$0xff] }
 0x283   : > { %773 = vst [vmem:[%s1585_s24] sm:$0xff] %v757_v34  ;;  %774 = vst [vmem:[%s1585_s24 + $0x8] sm:$0xff] %v758_v35  ;;  %v760_v37 = vld [vmem:[#allocation2 + $0x18] sm:$0xff]  ;;  %v761_v38 = vld [vmem:[#allocation2 + $0x50] sm:$0xff] }
 0x284   : > { %775 = vst [vmem:[%s1585_s24 + $0x10] sm:$0xff] %v759_v36  ;;  %v762_v39 = vld [vmem:[#allocation2 + $0x68] sm:$0xff]  ;;  %776 = vst [vmem:[%s1585_s24 + $0x18] sm:$0xff] %v760_v37  ;;  %v765_v42 = vld [vmem:[#allocation2 + $0x40] sm:$0xff] }
 0x285   : > { %777 = vst [vmem:[%s1585_s24 + $0x20] sm:$0xff] %v761_v38  ;;  %778 = vst [vmem:[%s1585_s24 + $0x28] sm:$0xff] %v762_v39  ;;  %v763_v40 = vld [vmem:[#allocation2 + $0x8] sm:$0xff]  ;;  %v766_v43 = vld [vmem:[#allocation2 + $0x20] sm:$0xff] }
 0x286   : > { %v764_v41 = vld [vmem:[#allocation2 + $0x48] sm:$0xff]  ;;  %779 = vst [vmem:[%s1585_s24 + $0x30] sm:$0xff] %v763_v40  ;;  %781 = vst [vmem:[%s1585_s24 + $0x40] sm:$0xff] %v765_v42  ;;  %v767_v44 = vld [vmem:[#allocation2 + $0x10] sm:$0xff] }
 0x287   : > { %780 = vst [vmem:[%s1585_s24 + $0x38] sm:$0xff] %v764_v41  ;;  %v768_v45 = vld [vmem:[#allocation2 + $0x38] sm:$0xff]  ;;  %782 = vst [vmem:[%s1585_s24 + $0x48] sm:$0xff] %v766_v43  ;;  %v769_v46 = vld [vmem:[#allocation2 + $0x60] sm:$0xff] }
 0x288   : > { %783 = vst [vmem:[%s1585_s24 + $0x50] sm:$0xff] %v767_v44  ;;  %784 = vst [vmem:[%s1585_s24 + $0x58] sm:$0xff] %v768_v45  ;;  %v770_v47 = vld [vmem:[#allocation2 + $0x70] sm:$0xff]  ;;  %v771_v48 = vld [vmem:[#allocation2 + $0x78] sm:$0xff] }
 0x289   : > { %785 = vst [vmem:[%s1585_s24 + $0x60] sm:$0xff] %v769_v46  ;;  %786 = vst [vmem:[%s1585_s24 + $0x68] sm:$0xff] %v770_v47  ;;  %v772_v50 = vld [vmem:[#allocation2 + $0x28] sm:$0xff] }
 0x28a   : > { %787 = vst [vmem:[%s1585_s24 + $0x70] sm:$0xff] %v771_v48  ;;  %788 = vst [vmem:[%s1585_s24 + $0x78] sm:$0xff] %v772_v50 }
 0x28b PF: > { %s1837_s28 = sld [smem:[#allocation16_spill]]  ;;  %s804_s15 = sshll.u32 %s1585_s24, 4  ;;  %s1732_s15 = int_to_ptr.vmem [resolvable:$true] %s804_s15 }
 0x28c   : > { %s1838_s26 = sld [smem:[#allocation22_spill]]  ;;  %s790_s18 = scalar_lea.sflag [#allocation5], %s1565_s3 }
 0x28d   : > { %s1208_s5 = scalar_lea.vmem %s1732_s15, 2048  ;;  %p1839_p10 = scmp.ne.s32.totalorder %s1828_s25, 0 }
 0x28e   : > { %p1209_p12 = scmp.ne.s32.totalorder %s1732_s15, %s1208_s5  ;;  %s1341_s14 = smov [#allocation9]  }
 0x28f   : > { %s1212_s21 = sshll.u32 %s1341_s14, 4  ;;  %s1213_s21 = int_to_ptr.vmem [resolvable:$false] %s1212_s21 }
 0x290   : > { %p1210_p0 = pnand %p1209_p12, %p1839_p10  ;;  %s1214_s12 = scalar_lea.vmem %s1213_s21, 4096 }
 0x291   : > { %s973_s6 = sshll.u32 %s1837_s28, 11  ;;  %p1215_p2 = scmp.lt.s32.totalorder %s1732_s15, %s1213_s21 }
 0x292   : > { %s1729_s7 = scalar_lea.hbm %s1838_s26, %s973_s6  ;;  %p1211_p13 = pneg %p1210_p0 }
 0x293   : > { %p1216_p3 = scmp.lt.s32.totalorder %s1214_s12, %s1208_s5 }
 0x295   : > { %p1217_p4 = por %p1216_p3, %p1215_p2 }
 0x297   : > { %p1218_p5 = pnand %p1217_p4, %p1211_p13 }
 0x299   : > { %1221 = shalt.err (!%p1218_p5)
}
 0x29a   : > { %s1222_s27 = scalar_lea.hbm %s1729_s7, 2048  ;;  %s1226_s19 = scalar_lea.hbm %s1838_s26, 4096 }
 0x29b   : > { %p1223_p11 = scmp.ne.s32.totalorder %s1729_s7, %s1222_s27  ;;  %p1227_p1 = scmp.lt.s32.totalorder %s1729_s7, %s1838_s26 }
 0x29c   : > { %p1228_p9 = scmp.lt.s32.totalorder %s1226_s19, %s1222_s27 }
 0x29d   : > { %p1224_p8 = pnand %p1223_p11, %p1839_p10 }
 0x29e   : > { %p1229_p7 = por %p1228_p9, %p1227_p1 }
 0x29f   : > { %p1225_p6 = pneg %p1224_p8 }
 0x2a1   : > { %p1230_p12 = pnand %p1229_p7, %p1225_p6 }
 0x2a3   : > { %1233 = shalt.err (!%p1230_p12)
}
 0x2a4   : > { %s1342_s11 = smov 256   ;;  %s1343_s23 = smov 16  }
 0x2a5   : > { %980 = dma.vmem_to_hbm [thread:$0]  (%p1839_p10), %s1732_s15, 2048, %s1729_s7, %s790_s18, %s1342_s11, %s1342_s11, %s1343_s23  }
 0x2a6 PF: > { %s1840_s28 = sld [smem:[#allocation14_spill]]  ;;  %p997_p0 = scmp.ge.s32.totalorder %s1332_s22, 2 }
 0x2a7   : > { %p1841_p13 = scmp.ne.s32.totalorder %s1829_s4, 0 }
 0x2a9   : > { %p993_p2 = pnand %p997_p0, %p1841_p13 }
 0x2ab   : > { %p994_p3 = pneg %p993_p2 }
 0x2ac   : > { %s819_s6 = sand.u32 1, %s1840_s28  }
 0x2ad   : > { %s820_s9 = scalar_lea.sflag [#allocation5], %s819_s6 }
 0x2ae   : > { %1287 = dma.done.wait (%p994_p3), %s820_s9, 2048  }
 0x2af   : > { %1289 = vsyncadd (%p994_p3), %s820_s9, 4294965248  ;;  %s22_s22 = sadd.s32 1, %s1332_s22   ;;  %s1842_s30 = sld [smem:[#allocation13_spill]] }
 0x2b0   : > { %p19_p4 = scmp.ge.s32.totalorder %s22_s22, 10   ;;  %s1843_s14 = sld [smem:[#allocation19_spill]] }
 0x2b1   : > { %s1844_s19 = sld [smem:[#allocation17_spill]]  ;;  %s1847_s12 = smov %s1296_s13 }
 0x2b2   : > { %s1845_s25 = sld [smem:[#allocation18_spill]]  ;;  %s1849_s15 = smov %s1308_s16 }
 0x2b3   : > { %s1846_s21 = sld [smem:[#allocation20_spill]]  ;;  %s1850_s16 = smov %s1312_s17 }
 0x2b4   : > { %s1851_s17 = smov %s1519_s1  ;;  %s1852_s18 = smov %s1324_s20 }
 0x2b5   : > { %s1848_s13 = smov %s1842_s30  ;;  %21 = sbr.rel (!%p19_p4) target bundleno = 14 (0xe), region = 109 }
 0x2b8   : > { %s1853_s20 = smov %s1845_s25 }
 0x2ba   :  { %825 = vsyncpa [#allocation4], 1 }
 0x2bb   :  { %827 = vsyncpa [#allocation4 + $0x1], 1 }
 0x2bc   :  { %828 = vsyncpa [#allocation7], 1 }
 0x2bd   :  { %830 = vsyncpa [#allocation7 + $0x1], 1 }
 0x2be   :  { %831 = vsyncpa [#allocation5], 1 }
 0x2bf   :  { %833 = vsyncpa [#allocation5 + $0x1], 1 }

</bundles_post_ra>
